<compile_context>
chip_gen: v5e
topology: v5e:2x2
jax: 0.10.0
libtpu: 0.0.40
codegen_flags: <defaults>
</compile_context>

<pallas_src>
import functools

import jax
import jax.numpy as jnp
import numpy as np
from jax.experimental import pallas as pl
from jax.experimental.pallas import tpu as pltpu

# PyTorch gate order i, f, g, o.  i/f/o columns carry a folded 0.5 so that a
# single tanh pass yields sigmoid via sigmoid(x) = 0.5*(tanh(x/2)+1).
_GATE_SCALE = (0.5, 0.5, 1.0, 0.5)


# ----------------------------- Pallas kernel --------------------------------
def _lstm_fused_kernel(*refs, batch, hidden, num_dirs):
    """Whole-sequence (bi)LSTM layer in a single kernel invocation.

    Ref layout (D = num_dirs, HD = D*H, gate columns interleaved
    [i_f i_b | f_f f_b | g_f g_b | o_f o_b]):
      D == 1: x(T*B,In), wx(In,4H), wh(H,4H), b(1,4H), h0(B,H), c0(B,H)
              -> out(T,B,H), hn(B,H), cn(B,H)
      D == 2: x(T*B,In), xrev(T*B,In), wx_f(In,4HD), wx_b(In,4HD),
              wh(HD,4HD), b(1,4HD), h0(B,HD), c0(B,HD)
              -> out(T,B,HD), hn(B,HD), cn(B,HD)   + scratch hbuf(T,B,HD)
    """
    B, H, D = batch, hidden, num_dirs
    HD = D * H
    if D == 2:
        (x_ref, xrev_ref, wxf_ref, wxb_ref, wh_ref, b_ref, h0_ref, c0_ref,
         out_ref, hn_ref, cn_ref, hbuf_scr) = refs
    else:
        (x_ref, wxf_ref, wh_ref, b_ref, h0_ref, c0_ref,
         out_ref, hn_ref, cn_ref) = refs
        xrev_ref = wxb_ref = hbuf_scr = None
    T = x_ref.shape[0] // B

    # --- hoisted off the serial chain: bulk input projection + fwd/bwd merge.
    # wx_f has only forward-direction columns populated, wx_b only backward,
    # and the backward projection reads the time-reversed input, so `merged`
    # already holds the correct gate inputs for BOTH directions at every step
    # (no per-step select / mask / reversal, no `mask` input at all).
    merged = jnp.dot(x_ref[...], wxf_ref[...],
                     preferred_element_type=jnp.float32)
    if D == 2:
        merged = merged + jnp.dot(xrev_ref[...], wxb_ref[...],
                                  preferred_element_type=jnp.float32)
    merged = merged + b_ref[...]                        # (T*B, 4*HD)

    wh = wh_ref[...]                                    # (HD, 4*HD)
    h = h0_ref[...]                                     # (B, HD)
    c = c0_ref[...]                                     # (B, HD)

    # T is small and static -> fully unrolled loop, every slice static.
    for s in range(T):
        # single recurrent matmul on the critical path
        gates = merged[s * B:(s + 1) * B, :] + jnp.dot(
            h, wh, preferred_element_type=jnp.float32)
        tg = jnp.tanh(gates)                            # ONE EUP pass / step
        i = 0.5 * (tg[:, 0 * HD:1 * HD] + 1.0)          # sigmoid via tanh id.
        f = 0.5 * (tg[:, 1 * HD:2 * HD] + 1.0)
        g = tg[:, 2 * HD:3 * HD]
        o = 0.5 * (tg[:, 3 * HD:4 * HD] + 1.0)
        c = f * c + i * g
        h = o * jnp.tanh(c)
        if D == 2:
            hbuf_scr[s] = h                             # one full-width store
        else:
            out_ref[s] = h.astype(out_ref.dtype)

    if D == 2:
        # Bulk unscramble, off the critical path: the forward half keeps time
        # order, the backward half is time-reversed.
        col = jax.lax.broadcasted_iota(jnp.int32, (B, HD), 1)
        is_fwd_col = col < H
        for u in range(T):
            out_ref[u] = jnp.where(is_fwd_col, hbuf_scr[u],
                                   hbuf_scr[T - 1 - u]).astype(out_ref.dtype)

    hn_ref[...] = h.astype(hn_ref.dtype)
    cn_ref[...] = c.astype(cn_ref.dtype)


def lstm_layer_fused(x_tbi, wx_f, wx_b, wh, b, h0, c0, *, num_dirs, hidden):
    """Run one (bi)LSTM layer over the whole sequence with one pallas_call."""
    T, B, In = x_tbi.shape
    HD = num_dirs * hidden
    x2d = x_tbi.reshape(T * B, In)        # pure reshape of time-major data

    kernel = functools.partial(_lstm_fused_kernel, batch=B, hidden=hidden,
                               num_dirs=num_dirs)
    out_shapes = (
        jax.ShapeDtypeStruct((T, B, HD), x_tbi.dtype),
        jax.ShapeDtypeStruct((B, HD), x_tbi.dtype),
        jax.ShapeDtypeStruct((B, HD), x_tbi.dtype),
    )
    vmem = pl.BlockSpec(memory_space=pltpu.MemorySpace.VMEM)
    if num_dirs == 2:
        xrev2d = x_tbi[::-1].reshape(T * B, In)   # once per call, fused by jit
        inputs = (x2d, xrev2d, wx_f, wx_b, wh, b, h0, c0)
        scratch = [pltpu.VMEM((T, B, HD), jnp.float32)]
    else:
        inputs = (x2d, wx_f, wh, b, h0, c0)
        scratch = []
    return pl.pallas_call(
        kernel,
        out_shape=out_shapes,
        # no grid: everything is VMEM-resident, one kernel invocation
        in_specs=[vmem] * len(inputs),
        out_specs=(vmem, vmem, vmem),
        scratch_shapes=scratch,
    )(*inputs)


# --------------------------- weight packing ----------------------------------
def _pack_layer_params(dir_params, in_dim, H, D):
    """Pack per-direction PyTorch-layout LSTM params into the fused layout.

    Returns (wx_f, wx_b, wh, b): wx_f holds only forward-direction columns,
    wx_b only backward-direction columns (None when unidirectional); a 0.5
    scale is folded into the i/f/o columns of wx/wh/b (single-tanh trick).
    """
    HD = D * H
    wx_f = np.zeros((in_dim, 4 * HD), np.float32)
    wx_b = np.zeros((in_dim, 4 * HD), np.float32) if D == 2 else None
    wh = np.zeros((HD, 4 * HD), np.float32)
    b = np.zeros((1, 4 * HD), np.float32)
    for d, (w_ih, w_hh, b_ih, b_hh) in enumerate(dir_params):
        w_ih = np.asarray(w_ih)                    # (4H, in_dim)
        w_hh = np.asarray(w_hh)                    # (4H, H)
        bias = np.asarray(b_ih) + np.asarray(b_hh)
        wx_dst = wx_f if d == 0 else wx_b
        for gate in range(4):                      # PyTorch gate order i,f,g,o
            sc = _GATE_SCALE[gate]
            cols = slice(gate * HD + d * H, gate * HD + (d + 1) * H)
            wx_dst[:, cols] = sc * w_ih[gate * H:(gate + 1) * H, :].T
            wh[d * H:(d + 1) * H, cols] = sc * w_hh[gate * H:(gate + 1) * H, :].T
            b[0, cols] = sc * bias[gate * H:(gate + 1) * H]
    return (jnp.asarray(wx_f),
            jnp.asarray(wx_b) if wx_b is not None else None,
            jnp.asarray(wh), jnp.asarray(b))


# ------------------------------ Encoder glue ---------------------------------
class Encoder:
    """JAX/Pallas mirror of the PyTorch Encoder module (inference semantics)."""

    def __init__(self, embedding_dim, hidden_dim, n_layers, dropout, bidirect,
                 key):
        self.hidden_dim = hidden_dim // 2 if bidirect else hidden_dim
        self.n_layers = n_layers * 2 if bidirect else n_layers  # as in module
        self.bidirect = bidirect
        self.lstm_layers = n_layers
        self.num_dirs = 2 if bidirect else 1
        self.dropout = dropout
        # TODO(synk): inter-layer dropout not applied (inference / eval mode;
        # with a single LSTM layer PyTorch ignores it anyway).

        H = self.hidden_dim
        D = self.num_dirs
        k = 1.0 / np.sqrt(H)
        self.raw_params = []   # [layer][dir] = (w_ih, w_hh, b_ih, b_hh)
        self.packed = []       # [layer] = (wx_f, wx_b, wh, b)
        for layer in range(self.lstm_layers):
            in_dim = embedding_dim if layer == 0 else H * D
            dir_params = []
            for _ in range(D):
                key, k1, k2, k3, k4 = jax.random.split(key, 5)
                w_ih = jax.random.uniform(k1, (4 * H, in_dim), jnp.float32, -k, k)
                w_hh = jax.random.uniform(k2, (4 * H, H), jnp.float32, -k, k)
                b_ih = jax.random.uniform(k3, (4 * H,), jnp.float32, -k, k)
                b_hh = jax.random.uniform(k4, (4 * H,), jnp.float32, -k, k)
                dir_params.append((w_ih, w_hh, b_ih, b_hh))
            self.raw_params.append(dir_params)
            self.packed.append(_pack_layer_params(dir_params, in_dim, H, D))

        # One jitted dispatch for the whole forward: transposes, state
        # concat/split/stack and the per-layer pallas_call all fuse into a
        # single XLA program (eager glue dominated wall clock at these sizes).
        self._forward_jit = jax.jit(self._forward_impl)

    def init_hidden(self, embedded_inputs):
        batch_size = embedded_inputs.shape[0]
        h0 = jnp.zeros((self.n_layers, batch_size, self.hidden_dim), jnp.float32)
        c0 = jnp.zeros((self.n_layers, batch_size, self.hidden_dim), jnp.float32)
        return (h0, c0)

    def _forward_impl(self, embedded_inputs, hidden):
        # embedded_inputs: (B, T, E); hidden: (h0, c0), each (layers*dirs, B, H)
        D, H = self.num_dirs, self.hidden_dim
        x = jnp.transpose(embedded_inputs, (1, 0, 2))   # time-major (T, B, E)
        h0_all, c0_all = hidden
        h_n, c_n = [], []
        layer_in = x
        for layer in range(self.lstm_layers):
            wx_f, wx_b, wh, b = self.packed[layer]
            h0 = jnp.concatenate([h0_all[layer * D + d] for d in range(D)], -1)
            c0 = jnp.concatenate([c0_all[layer * D + d] for d in range(D)], -1)
            out, hn, cn = lstm_layer_fused(layer_in, wx_f, wx_b, wh, b, h0, c0,
                                           num_dirs=D, hidden=H)
            for d in range(D):
                h_n.append(hn[:, d * H:(d + 1) * H])
                c_n.append(cn[:, d * H:(d + 1) * H])
            layer_in = out
        outputs = jnp.transpose(layer_in, (1, 0, 2))    # (B, T, D*H)
        return outputs, (jnp.stack(h_n, axis=0), jnp.stack(c_n, axis=0))

    def forward(self, embedded_inputs, hidden):
        return self._forward_jit(embedded_inputs, hidden)


# ----------------------- pure-JAX reference (for checking) -------------------
def _lstm_direction_ref(x_tbe, h0, c0, w_ih, w_hh, b_ih, b_hh):
    H = h0.shape[-1]
    w_ih_t, w_hh_t, bias = w_ih.T, w_hh.T, b_ih + b_hh
    hp = jax.lax.Precision.HIGHEST

    def step(carry, x_t):
        h, c = carry
        gates = (jnp.dot(x_t, w_ih_t, precision=hp)
                 + jnp.dot(h, w_hh_t, precision=hp) + bias)
        i = jax.nn.sigmoid(gates[:, 0 * H:1 * H])
        f = jax.nn.sigmoid(gates[:, 1 * H:2 * H])
        g = jnp.tanh(gates[:, 2 * H:3 * H])
        o = jax.nn.sigmoid(gates[:, 3 * H:4 * H])
        c = f * c + i * g
        h = o * jnp.tanh(c)
        return (h, c), h

    (h, c), out = jax.lax.scan(step, (h0, c0), x_tbe)
    return out, h, c


def _encoder_forward_ref(enc, embedded_inputs, hidden):
    x = jnp.transpose(embedded_inputs, (1, 0, 2))
    h0_all, c0_all = hidden
    D = enc.num_dirs
    h_n, c_n = [], []
    layer_in = x
    for layer in range(enc.lstm_layers):
        dir_outs = []
        for d in range(D):
            idx = layer * D + d
            w_ih, w_hh, b_ih, b_hh = enc.raw_params[layer][d]
            xin = layer_in if d == 0 else layer_in[::-1]
            out, hn, cn = _lstm_direction_ref(xin, h0_all[idx], c0_all[idx],
                                              w_ih, w_hh, b_ih, b_hh)
            if d == 1:
                out = out[::-1]
            dir_outs.append(out)
            h_n.append(hn)
            c_n.append(cn)
        layer_in = (jnp.concatenate(dir_outs, axis=-1) if D == 2 else dir_outs[0])
    return (jnp.transpose(layer_in, (1, 0, 2)),
            (jnp.stack(h_n, 0), jnp.stack(c_n, 0)))


# ----------------------------------- main ------------------------------------
if __name__ == "__main__":
    B, T, E = 2, 8, 32          # batch, sequence length, embedding_dim
    hidden_dim = 32             # module hidden_dim (split /2 when bidirectional)
    n_layers = 1

    for bidirect in (True, False):
        key = jax.random.PRNGKey(0)
        key, pkey, xkey, hkey, ckey = jax.random.split(key, 5)

        enc = Encoder(E, hidden_dim, n_layers, dropout=0.0, bidirect=bidirect,
                      key=pkey)
        embedded_inputs = jax.random.normal(xkey, (B, T, E), dtype=jnp.float32)

        # init_hidden (zeros) matches the module; add small noise to also
        # exercise a non-trivial initial state.
        zeros_h, zeros_c = enc.init_hidden(embedded_inputs)
        h0 = zeros_h + 0.1 * jax.random.normal(hkey, zeros_h.shape, jnp.float32)
        c0 = zeros_c + 0.1 * jax.random.normal(ckey, zeros_c.shape, jnp.float32)
        hidden = (h0, c0)

        outputs, (h_n, c_n) = enc.forward(embedded_inputs, hidden)
        outputs = jax.block_until_ready(outputs)
        h_n = jax.block_until_ready(h_n)
        c_n = jax.block_until_ready(c_n)

        ref_out, (ref_h, ref_c) = _encoder_forward_ref(enc, embedded_inputs,
                                                       hidden)

        feat = enc.hidden_dim * enc.num_dirs
        assert outputs.shape == (B, T, feat)
        assert h_n.shape == (enc.n_layers, B, enc.hidden_dim)
        assert c_n.shape == (enc.n_layers, B, enc.hidden_dim)
        np.testing.assert_allclose(np.asarray(outputs), np.asarray(ref_out),
                                   rtol=2e-5, atol=2e-5)
        np.testing.assert_allclose(np.asarray(h_n), np.asarray(ref_h),
                                   rtol=2e-5, atol=2e-5)
        np.testing.assert_allclose(np.asarray(c_n), np.asarray(ref_c),
                                   rtol=2e-5, atol=2e-5)

    print("KERNEL_OK")
</pallas_src>

<mosaic_0001>
module attributes {stable_mosaic.version = 11 : i64} {
  func.func @_lstm_fused_kernel(%arg0: memref<16x32xf32, #tpu.memory_space<vmem>>, %arg1: memref<16x32xf32, #tpu.memory_space<vmem>>, %arg2: memref<32x128xf32, #tpu.memory_space<vmem>>, %arg3: memref<32x128xf32, #tpu.memory_space<vmem>>, %arg4: memref<32x128xf32, #tpu.memory_space<vmem>>, %arg5: memref<1x128xf32, #tpu.memory_space<vmem>>, %arg6: memref<2x32xf32, #tpu.memory_space<vmem>>, %arg7: memref<2x32xf32, #tpu.memory_space<vmem>>, %arg8: memref<8x2x32xf32, #tpu.memory_space<vmem>>, %arg9: memref<2x32xf32, #tpu.memory_space<vmem>>, %arg10: memref<2x32xf32, #tpu.memory_space<vmem>>, %arg11: memref<8x2x32xf32, #tpu.memory_space<vmem>>) attributes {dimension_semantics = [], scalar_prefetch = 0 : i64, scratch_operands = 1 : i64, tpu.core_type = #tpu.core_type<tc>} {
    %c0 = arith.constant 0 : index
    %c0_0 = arith.constant 0 : index
    %0 = vector.load %arg0[%c0, %c0_0] : memref<16x32xf32, #tpu.memory_space<vmem>>, vector<16x32xf32>
    %c0_1 = arith.constant 0 : index
    %c0_2 = arith.constant 0 : index
    %1 = vector.load %arg2[%c0_1, %c0_2] : memref<32x128xf32, #tpu.memory_space<vmem>>, vector<32x128xf32>
    %cst = arith.constant dense<0.000000e+00> : vector<16x128xf32>
    %2 = tpu.matmul %0, %1, %cst {dimension_numbers = #tpu.dot_dimension_numbers<[1], [0], [0], [1], [0, 0, 1, 1], [], []>} : vector<16x32xf32>, vector<32x128xf32>, vector<16x128xf32> -> vector<16x128xf32>
    %c0_3 = arith.constant 0 : index
    %c0_4 = arith.constant 0 : index
    %3 = vector.load %arg1[%c0_3, %c0_4] : memref<16x32xf32, #tpu.memory_space<vmem>>, vector<16x32xf32>
    %c0_5 = arith.constant 0 : index
    %c0_6 = arith.constant 0 : index
    %4 = vector.load %arg3[%c0_5, %c0_6] : memref<32x128xf32, #tpu.memory_space<vmem>>, vector<32x128xf32>
    %cst_7 = arith.constant dense<0.000000e+00> : vector<16x128xf32>
    %5 = tpu.matmul %3, %4, %cst_7 {dimension_numbers = #tpu.dot_dimension_numbers<[1], [0], [0], [1], [0, 0, 1, 1], [], []>} : vector<16x32xf32>, vector<32x128xf32>, vector<16x128xf32> -> vector<16x128xf32>
    %6 = arith.addf %2, %5 : vector<16x128xf32>
    %c0_8 = arith.constant 0 : index
    %c0_9 = arith.constant 0 : index
    %7 = vector.load %arg5[%c0_8, %c0_9] : memref<1x128xf32, #tpu.memory_space<vmem>>, vector<1x128xf32>
    %8 = vector.broadcast %7 : vector<1x128xf32> to vector<16x128xf32>
    %9 = arith.addf %6, %8 : vector<16x128xf32>
    %c0_10 = arith.constant 0 : index
    %c0_11 = arith.constant 0 : index
    %10 = vector.load %arg4[%c0_10, %c0_11] : memref<32x128xf32, #tpu.memory_space<vmem>>, vector<32x128xf32>
    %c0_12 = arith.constant 0 : index
    %c0_13 = arith.constant 0 : index
    %11 = vector.load %arg6[%c0_12, %c0_13] : memref<2x32xf32, #tpu.memory_space<vmem>>, vector<2x32xf32>
    %c0_14 = arith.constant 0 : index
    %c0_15 = arith.constant 0 : index
    %12 = vector.load %arg7[%c0_14, %c0_15] : memref<2x32xf32, #tpu.memory_space<vmem>>, vector<2x32xf32>
    %13 = vector.extract_strided_slice %9 {offsets = [0, 0], sizes = [2, 128], strides = [1, 1]} : vector<16x128xf32> to vector<2x128xf32>
    %cst_16 = arith.constant dense<0.000000e+00> : vector<2x128xf32>
    %14 = tpu.matmul %11, %10, %cst_16 {dimension_numbers = #tpu.dot_dimension_numbers<[1], [0], [0], [1], [0, 0, 1, 1], [], []>} : vector<2x32xf32>, vector<32x128xf32>, vector<2x128xf32> -> vector<2x128xf32>
    %15 = arith.addf %13, %14 : vector<2x128xf32>
    %16 = math.tanh %15 : vector<2x128xf32>
    %17 = vector.extract_strided_slice %16 {offsets = [0, 0], sizes = [2, 32], strides = [1, 1]} : vector<2x128xf32> to vector<2x32xf32>
    %cst_17 = arith.constant 1.000000e+00 : f32
    %18 = vector.broadcast %cst_17 : f32 to vector<2x32xf32>
    %19 = arith.addf %17, %18 : vector<2x32xf32>
    %cst_18 = arith.constant 5.000000e-01 : f32
    %20 = vector.broadcast %cst_18 : f32 to vector<2x32xf32>
    %21 = arith.mulf %20, %19 : vector<2x32xf32>
    %22 = vector.extract_strided_slice %16 {offsets = [0, 32], sizes = [2, 32], strides = [1, 1]} : vector<2x128xf32> to vector<2x32xf32>
    %cst_19 = arith.constant 1.000000e+00 : f32
    %23 = vector.broadcast %cst_19 : f32 to vector<2x32xf32>
    %24 = arith.addf %22, %23 : vector<2x32xf32>
    %cst_20 = arith.constant 5.000000e-01 : f32
    %25 = vector.broadcast %cst_20 : f32 to vector<2x32xf32>
    %26 = arith.mulf %25, %24 : vector<2x32xf32>
    %27 = vector.extract_strided_slice %16 {offsets = [0, 64], sizes = [2, 32], strides = [1, 1]} : vector<2x128xf32> to vector<2x32xf32>
    %28 = vector.extract_strided_slice %16 {offsets = [0, 96], sizes = [2, 32], strides = [1, 1]} : vector<2x128xf32> to vector<2x32xf32>
    %cst_21 = arith.constant 1.000000e+00 : f32
    %29 = vector.broadcast %cst_21 : f32 to vector<2x32xf32>
    %30 = arith.addf %28, %29 : vector<2x32xf32>
    %cst_22 = arith.constant 5.000000e-01 : f32
    %31 = vector.broadcast %cst_22 : f32 to vector<2x32xf32>
    %32 = arith.mulf %31, %30 : vector<2x32xf32>
    %33 = arith.mulf %26, %12 : vector<2x32xf32>
    %34 = arith.mulf %21, %27 : vector<2x32xf32>
    %35 = arith.addf %33, %34 : vector<2x32xf32>
    %36 = math.tanh %35 : vector<2x32xf32>
    %37 = arith.mulf %32, %36 : vector<2x32xf32>
    %c0_23 = arith.constant 0 : index
    %c0_24 = arith.constant 0 : index
    %c0_25 = arith.constant 0 : index
    %38 = vector.load %arg11[%c0_23, %c0_24, %c0_25] : memref<8x2x32xf32, #tpu.memory_space<vmem>>, vector<1x2x32xf32>
    %39 = vector.shape_cast %38 : vector<1x2x32xf32> to vector<2x32xf32>
    %40 = vector.shape_cast %37 : vector<2x32xf32> to vector<1x2x32xf32>
    tpu.vector_store %arg11[%c0_23, %c0_24, %c0_25], %40 {strides = array<i32>} : memref<8x2x32xf32, #tpu.memory_space<vmem>>, vector<1x2x32xf32>,
    %41 = vector.extract_strided_slice %9 {offsets = [2, 0], sizes = [2, 128], strides = [1, 1]} : vector<16x128xf32> to vector<2x128xf32>
    %cst_26 = arith.constant dense<0.000000e+00> : vector<2x128xf32>
    %42 = tpu.matmul %37, %10, %cst_26 {dimension_numbers = #tpu.dot_dimension_numbers<[1], [0], [0], [1], [0, 0, 1, 1], [], []>} : vector<2x32xf32>, vector<32x128xf32>, vector<2x128xf32> -> vector<2x128xf32>
    %43 = arith.addf %41, %42 : vector<2x128xf32>
    %44 = math.tanh %43 : vector<2x128xf32>
    %45 = vector.extract_strided_slice %44 {offsets = [0, 0], sizes = [2, 32], strides = [1, 1]} : vector<2x128xf32> to vector<2x32xf32>
    %cst_27 = arith.constant 1.000000e+00 : f32
    %46 = vector.broadcast %cst_27 : f32 to vector<2x32xf32>
    %47 = arith.addf %45, %46 : vector<2x32xf32>
    %cst_28 = arith.constant 5.000000e-01 : f32
    %48 = vector.broadcast %cst_28 : f32 to vector<2x32xf32>
    %49 = arith.mulf %48, %47 : vector<2x32xf32>
    %50 = vector.extract_strided_slice %44 {offsets = [0, 32], sizes = [2, 32], strides = [1, 1]} : vector<2x128xf32> to vector<2x32xf32>
    %cst_29 = arith.constant 1.000000e+00 : f32
    %51 = vector.broadcast %cst_29 : f32 to vector<2x32xf32>
    %52 = arith.addf %50, %51 : vector<2x32xf32>
    %cst_30 = arith.constant 5.000000e-01 : f32
    %53 = vector.broadcast %cst_30 : f32 to vector<2x32xf32>
    %54 = arith.mulf %53, %52 : vector<2x32xf32>
    %55 = vector.extract_strided_slice %44 {offsets = [0, 64], sizes = [2, 32], strides = [1, 1]} : vector<2x128xf32> to vector<2x32xf32>
    %56 = vector.extract_strided_slice %44 {offsets = [0, 96], sizes = [2, 32], strides = [1, 1]} : vector<2x128xf32> to vector<2x32xf32>
    %cst_31 = arith.constant 1.000000e+00 : f32
    %57 = vector.broadcast %cst_31 : f32 to vector<2x32xf32>
    %58 = arith.addf %56, %57 : vector<2x32xf32>
    %cst_32 = arith.constant 5.000000e-01 : f32
    %59 = vector.broadcast %cst_32 : f32 to vector<2x32xf32>
    %60 = arith.mulf %59, %58 : vector<2x32xf32>
    %61 = arith.mulf %54, %35 : vector<2x32xf32>
    %62 = arith.mulf %49, %55 : vector<2x32xf32>
    %63 = arith.addf %61, %62 : vector<2x32xf32>
    %64 = math.tanh %63 : vector<2x32xf32>
    %65 = arith.mulf %60, %64 : vector<2x32xf32>
    %c1 = arith.constant 1 : index
    %c0_33 = arith.constant 0 : index
    %c0_34 = arith.constant 0 : index
    %66 = vector.load %arg11[%c1, %c0_33, %c0_34] : memref<8x2x32xf32, #tpu.memory_space<vmem>>, vector<1x2x32xf32>
    %67 = vector.shape_cast %66 : vector<1x2x32xf32> to vector<2x32xf32>
    %68 = vector.shape_cast %65 : vector<2x32xf32> to vector<1x2x32xf32>
    tpu.vector_store %arg11[%c1, %c0_33, %c0_34], %68 {strides = array<i32>} : memref<8x2x32xf32, #tpu.memory_space<vmem>>, vector<1x2x32xf32>,
    %69 = vector.extract_strided_slice %9 {offsets = [4, 0], sizes = [2, 128], strides = [1, 1]} : vector<16x128xf32> to vector<2x128xf32>
    %cst_35 = arith.constant dense<0.000000e+00> : vector<2x128xf32>
    %70 = tpu.matmul %65, %10, %cst_35 {dimension_numbers = #tpu.dot_dimension_numbers<[1], [0], [0], [1], [0, 0, 1, 1], [], []>} : vector<2x32xf32>, vector<32x128xf32>, vector<2x128xf32> -> vector<2x128xf32>
    %71 = arith.addf %69, %70 : vector<2x128xf32>
    %72 = math.tanh %71 : vector<2x128xf32>
    %73 = vector.extract_strided_slice %72 {offsets = [0, 0], sizes = [2, 32], strides = [1, 1]} : vector<2x128xf32> to vector<2x32xf32>
    %cst_36 = arith.constant 1.000000e+00 : f32
    %74 = vector.broadcast %cst_36 : f32 to vector<2x32xf32>
    %75 = arith.addf %73, %74 : vector<2x32xf32>
    %cst_37 = arith.constant 5.000000e-01 : f32
    %76 = vector.broadcast %cst_37 : f32 to vector<2x32xf32>
    %77 = arith.mulf %76, %75 : vector<2x32xf32>
    %78 = vector.extract_strided_slice %72 {offsets = [0, 32], sizes = [2, 32], strides = [1, 1]} : vector<2x128xf32> to vector<2x32xf32>
    %cst_38 = arith.constant 1.000000e+00 : f32
    %79 = vector.broadcast %cst_38 : f32 to vector<2x32xf32>
    %80 = arith.addf %78, %79 : vector<2x32xf32>
    %cst_39 = arith.constant 5.000000e-01 : f32
    %81 = vector.broadcast %cst_39 : f32 to vector<2x32xf32>
    %82 = arith.mulf %81, %80 : vector<2x32xf32>
    %83 = vector.extract_strided_slice %72 {offsets = [0, 64], sizes = [2, 32], strides = [1, 1]} : vector<2x128xf32> to vector<2x32xf32>
    %84 = vector.extract_strided_slice %72 {offsets = [0, 96], sizes = [2, 32], strides = [1, 1]} : vector<2x128xf32> to vector<2x32xf32>
    %cst_40 = arith.constant 1.000000e+00 : f32
    %85 = vector.broadcast %cst_40 : f32 to vector<2x32xf32>
    %86 = arith.addf %84, %85 : vector<2x32xf32>
    %cst_41 = arith.constant 5.000000e-01 : f32
    %87 = vector.broadcast %cst_41 : f32 to vector<2x32xf32>
    %88 = arith.mulf %87, %86 : vector<2x32xf32>
    %89 = arith.mulf %82, %63 : vector<2x32xf32>
    %90 = arith.mulf %77, %83 : vector<2x32xf32>
    %91 = arith.addf %89, %90 : vector<2x32xf32>
    %92 = math.tanh %91 : vector<2x32xf32>
    %93 = arith.mulf %88, %92 : vector<2x32xf32>
    %c2 = arith.constant 2 : index
    %c0_42 = arith.constant 0 : index
    %c0_43 = arith.constant 0 : index
    %94 = vector.load %arg11[%c2, %c0_42, %c0_43] : memref<8x2x32xf32, #tpu.memory_space<vmem>>, vector<1x2x32xf32>
    %95 = vector.shape_cast %94 : vector<1x2x32xf32> to vector<2x32xf32>
    %96 = vector.shape_cast %93 : vector<2x32xf32> to vector<1x2x32xf32>
    tpu.vector_store %arg11[%c2, %c0_42, %c0_43], %96 {strides = array<i32>} : memref<8x2x32xf32, #tpu.memory_space<vmem>>, vector<1x2x32xf32>,
    %97 = vector.extract_strided_slice %9 {offsets = [6, 0], sizes = [2, 128], strides = [1, 1]} : vector<16x128xf32> to vector<2x128xf32>
    %cst_44 = arith.constant dense<0.000000e+00> : vector<2x128xf32>
    %98 = tpu.matmul %93, %10, %cst_44 {dimension_numbers = #tpu.dot_dimension_numbers<[1], [0], [0], [1], [0, 0, 1, 1], [], []>} : vector<2x32xf32>, vector<32x128xf32>, vector<2x128xf32> -> vector<2x128xf32>
    %99 = arith.addf %97, %98 : vector<2x128xf32>
    %100 = math.tanh %99 : vector<2x128xf32>
    %101 = vector.extract_strided_slice %100 {offsets = [0, 0], sizes = [2, 32], strides = [1, 1]} : vector<2x128xf32> to vector<2x32xf32>
    %cst_45 = arith.constant 1.000000e+00 : f32
    %102 = vector.broadcast %cst_45 : f32 to vector<2x32xf32>
    %103 = arith.addf %101, %102 : vector<2x32xf32>
    %cst_46 = arith.constant 5.000000e-01 : f32
    %104 = vector.broadcast %cst_46 : f32 to vector<2x32xf32>
    %105 = arith.mulf %104, %103 : vector<2x32xf32>
    %106 = vector.extract_strided_slice %100 {offsets = [0, 32], sizes = [2, 32], strides = [1, 1]} : vector<2x128xf32> to vector<2x32xf32>
    %cst_47 = arith.constant 1.000000e+00 : f32
    %107 = vector.broadcast %cst_47 : f32 to vector<2x32xf32>
    %108 = arith.addf %106, %107 : vector<2x32xf32>
    %cst_48 = arith.constant 5.000000e-01 : f32
    %109 = vector.broadcast %cst_48 : f32 to vector<2x32xf32>
    %110 = arith.mulf %109, %108 : vector<2x32xf32>
    %111 = vector.extract_strided_slice %100 {offsets = [0, 64], sizes = [2, 32], strides = [1, 1]} : vector<2x128xf32> to vector<2x32xf32>
    %112 = vector.extract_strided_slice %100 {offsets = [0, 96], sizes = [2, 32], strides = [1, 1]} : vector<2x128xf32> to vector<2x32xf32>
    %cst_49 = arith.constant 1.000000e+00 : f32
    %113 = vector.broadcast %cst_49 : f32 to vector<2x32xf32>
    %114 = arith.addf %112, %113 : vector<2x32xf32>
    %cst_50 = arith.constant 5.000000e-01 : f32
    %115 = vector.broadcast %cst_50 : f32 to vector<2x32xf32>
    %116 = arith.mulf %115, %114 : vector<2x32xf32>
    %117 = arith.mulf %110, %91 : vector<2x32xf32>
    %118 = arith.mulf %105, %111 : vector<2x32xf32>
    %119 = arith.addf %117, %118 : vector<2x32xf32>
    %120 = math.tanh %119 : vector<2x32xf32>
    %121 = arith.mulf %116, %120 : vector<2x32xf32>
    %c3 = arith.constant 3 : index
    %c0_51 = arith.constant 0 : index
    %c0_52 = arith.constant 0 : index
    %122 = vector.load %arg11[%c3, %c0_51, %c0_52] : memref<8x2x32xf32, #tpu.memory_space<vmem>>, vector<1x2x32xf32>
    %123 = vector.shape_cast %122 : vector<1x2x32xf32> to vector<2x32xf32>
    %124 = vector.shape_cast %121 : vector<2x32xf32> to vector<1x2x32xf32>
    tpu.vector_store %arg11[%c3, %c0_51, %c0_52], %124 {strides = array<i32>} : memref<8x2x32xf32, #tpu.memory_space<vmem>>, vector<1x2x32xf32>,
    %125 = vector.extract_strided_slice %9 {offsets = [8, 0], sizes = [2, 128], strides = [1, 1]} : vector<16x128xf32> to vector<2x128xf32>
    %cst_53 = arith.constant dense<0.000000e+00> : vector<2x128xf32>
    %126 = tpu.matmul %121, %10, %cst_53 {dimension_numbers = #tpu.dot_dimension_numbers<[1], [0], [0], [1], [0, 0, 1, 1], [], []>} : vector<2x32xf32>, vector<32x128xf32>, vector<2x128xf32> -> vector<2x128xf32>
    %127 = arith.addf %125, %126 : vector<2x128xf32>
    %128 = math.tanh %127 : vector<2x128xf32>
    %129 = vector.extract_strided_slice %128 {offsets = [0, 0], sizes = [2, 32], strides = [1, 1]} : vector<2x128xf32> to vector<2x32xf32>
    %cst_54 = arith.constant 1.000000e+00 : f32
    %130 = vector.broadcast %cst_54 : f32 to vector<2x32xf32>
    %131 = arith.addf %129, %130 : vector<2x32xf32>
    %cst_55 = arith.constant 5.000000e-01 : f32
    %132 = vector.broadcast %cst_55 : f32 to vector<2x32xf32>
    %133 = arith.mulf %132, %131 : vector<2x32xf32>
    %134 = vector.extract_strided_slice %128 {offsets = [0, 32], sizes = [2, 32], strides = [1, 1]} : vector<2x128xf32> to vector<2x32xf32>
    %cst_56 = arith.constant 1.000000e+00 : f32
    %135 = vector.broadcast %cst_56 : f32 to vector<2x32xf32>
    %136 = arith.addf %134, %135 : vector<2x32xf32>
    %cst_57 = arith.constant 5.000000e-01 : f32
    %137 = vector.broadcast %cst_57 : f32 to vector<2x32xf32>
    %138 = arith.mulf %137, %136 : vector<2x32xf32>
    %139 = vector.extract_strided_slice %128 {offsets = [0, 64], sizes = [2, 32], strides = [1, 1]} : vector<2x128xf32> to vector<2x32xf32>
    %140 = vector.extract_strided_slice %128 {offsets = [0, 96], sizes = [2, 32], strides = [1, 1]} : vector<2x128xf32> to vector<2x32xf32>
    %cst_58 = arith.constant 1.000000e+00 : f32
    %141 = vector.broadcast %cst_58 : f32 to vector<2x32xf32>
    %142 = arith.addf %140, %141 : vector<2x32xf32>
    %cst_59 = arith.constant 5.000000e-01 : f32
    %143 = vector.broadcast %cst_59 : f32 to vector<2x32xf32>
    %144 = arith.mulf %143, %142 : vector<2x32xf32>
    %145 = arith.mulf %138, %119 : vector<2x32xf32>
    %146 = arith.mulf %133, %139 : vector<2x32xf32>
    %147 = arith.addf %145, %146 : vector<2x32xf32>
    %148 = math.tanh %147 : vector<2x32xf32>
    %149 = arith.mulf %144, %148 : vector<2x32xf32>
    %c4 = arith.constant 4 : index
    %c0_60 = arith.constant 0 : index
    %c0_61 = arith.constant 0 : index
    %150 = vector.load %arg11[%c4, %c0_60, %c0_61] : memref<8x2x32xf32, #tpu.memory_space<vmem>>, vector<1x2x32xf32>
    %151 = vector.shape_cast %150 : vector<1x2x32xf32> to vector<2x32xf32>
    %152 = vector.shape_cast %149 : vector<2x32xf32> to vector<1x2x32xf32>
    tpu.vector_store %arg11[%c4, %c0_60, %c0_61], %152 {strides = array<i32>} : memref<8x2x32xf32, #tpu.memory_space<vmem>>, vector<1x2x32xf32>,
    %153 = vector.extract_strided_slice %9 {offsets = [10, 0], sizes = [2, 128], strides = [1, 1]} : vector<16x128xf32> to vector<2x128xf32>
    %cst_62 = arith.constant dense<0.000000e+00> : vector<2x128xf32>
    %154 = tpu.matmul %149, %10, %cst_62 {dimension_numbers = #tpu.dot_dimension_numbers<[1], [0], [0], [1], [0, 0, 1, 1], [], []>} : vector<2x32xf32>, vector<32x128xf32>, vector<2x128xf32> -> vector<2x128xf32>
    %155 = arith.addf %153, %154 : vector<2x128xf32>
    %156 = math.tanh %155 : vector<2x128xf32>
    %157 = vector.extract_strided_slice %156 {offsets = [0, 0], sizes = [2, 32], strides = [1, 1]} : vector<2x128xf32> to vector<2x32xf32>
    %cst_63 = arith.constant 1.000000e+00 : f32
    %158 = vector.broadcast %cst_63 : f32 to vector<2x32xf32>
    %159 = arith.addf %157, %158 : vector<2x32xf32>
    %cst_64 = arith.constant 5.000000e-01 : f32
    %160 = vector.broadcast %cst_64 : f32 to vector<2x32xf32>
    %161 = arith.mulf %160, %159 : vector<2x32xf32>
    %162 = vector.extract_strided_slice %156 {offsets = [0, 32], sizes = [2, 32], strides = [1, 1]} : vector<2x128xf32> to vector<2x32xf32>
    %cst_65 = arith.constant 1.000000e+00 : f32
    %163 = vector.broadcast %cst_65 : f32 to vector<2x32xf32>
    %164 = arith.addf %162, %163 : vector<2x32xf32>
    %cst_66 = arith.constant 5.000000e-01 : f32
    %165 = vector.broadcast %cst_66 : f32 to vector<2x32xf32>
    %166 = arith.mulf %165, %164 : vector<2x32xf32>
    %167 = vector.extract_strided_slice %156 {offsets = [0, 64], sizes = [2, 32], strides = [1, 1]} : vector<2x128xf32> to vector<2x32xf32>
    %168 = vector.extract_strided_slice %156 {offsets = [0, 96], sizes = [2, 32], strides = [1, 1]} : vector<2x128xf32> to vector<2x32xf32>
    %cst_67 = arith.constant 1.000000e+00 : f32
    %169 = vector.broadcast %cst_67 : f32 to vector<2x32xf32>
    %170 = arith.addf %168, %169 : vector<2x32xf32>
    %cst_68 = arith.constant 5.000000e-01 : f32
    %171 = vector.broadcast %cst_68 : f32 to vector<2x32xf32>
    %172 = arith.mulf %171, %170 : vector<2x32xf32>
    %173 = arith.mulf %166, %147 : vector<2x32xf32>
    %174 = arith.mulf %161, %167 : vector<2x32xf32>
    %175 = arith.addf %173, %174 : vector<2x32xf32>
    %176 = math.tanh %175 : vector<2x32xf32>
    %177 = arith.mulf %172, %176 : vector<2x32xf32>
    %c5 = arith.constant 5 : index
    %c0_69 = arith.constant 0 : index
    %c0_70 = arith.constant 0 : index
    %178 = vector.load %arg11[%c5, %c0_69, %c0_70] : memref<8x2x32xf32, #tpu.memory_space<vmem>>, vector<1x2x32xf32>
    %179 = vector.shape_cast %178 : vector<1x2x32xf32> to vector<2x32xf32>
    %180 = vector.shape_cast %177 : vector<2x32xf32> to vector<1x2x32xf32>
    tpu.vector_store %arg11[%c5, %c0_69, %c0_70], %180 {strides = array<i32>} : memref<8x2x32xf32, #tpu.memory_space<vmem>>, vector<1x2x32xf32>,
    %181 = vector.extract_strided_slice %9 {offsets = [12, 0], sizes = [2, 128], strides = [1, 1]} : vector<16x128xf32> to vector<2x128xf32>
    %cst_71 = arith.constant dense<0.000000e+00> : vector<2x128xf32>
    %182 = tpu.matmul %177, %10, %cst_71 {dimension_numbers = #tpu.dot_dimension_numbers<[1], [0], [0], [1], [0, 0, 1, 1], [], []>} : vector<2x32xf32>, vector<32x128xf32>, vector<2x128xf32> -> vector<2x128xf32>
    %183 = arith.addf %181, %182 : vector<2x128xf32>
    %184 = math.tanh %183 : vector<2x128xf32>
    %185 = vector.extract_strided_slice %184 {offsets = [0, 0], sizes = [2, 32], strides = [1, 1]} : vector<2x128xf32> to vector<2x32xf32>
    %cst_72 = arith.constant 1.000000e+00 : f32
    %186 = vector.broadcast %cst_72 : f32 to vector<2x32xf32>
    %187 = arith.addf %185, %186 : vector<2x32xf32>
    %cst_73 = arith.constant 5.000000e-01 : f32
    %188 = vector.broadcast %cst_73 : f32 to vector<2x32xf32>
    %189 = arith.mulf %188, %187 : vector<2x32xf32>
    %190 = vector.extract_strided_slice %184 {offsets = [0, 32], sizes = [2, 32], strides = [1, 1]} : vector<2x128xf32> to vector<2x32xf32>
    %cst_74 = arith.constant 1.000000e+00 : f32
    %191 = vector.broadcast %cst_74 : f32 to vector<2x32xf32>
    %192 = arith.addf %190, %191 : vector<2x32xf32>
    %cst_75 = arith.constant 5.000000e-01 : f32
    %193 = vector.broadcast %cst_75 : f32 to vector<2x32xf32>
    %194 = arith.mulf %193, %192 : vector<2x32xf32>
    %195 = vector.extract_strided_slice %184 {offsets = [0, 64], sizes = [2, 32], strides = [1, 1]} : vector<2x128xf32> to vector<2x32xf32>
    %196 = vector.extract_strided_slice %184 {offsets = [0, 96], sizes = [2, 32], strides = [1, 1]} : vector<2x128xf32> to vector<2x32xf32>
    %cst_76 = arith.constant 1.000000e+00 : f32
    %197 = vector.broadcast %cst_76 : f32 to vector<2x32xf32>
    %198 = arith.addf %196, %197 : vector<2x32xf32>
    %cst_77 = arith.constant 5.000000e-01 : f32
    %199 = vector.broadcast %cst_77 : f32 to vector<2x32xf32>
    %200 = arith.mulf %199, %198 : vector<2x32xf32>
    %201 = arith.mulf %194, %175 : vector<2x32xf32>
    %202 = arith.mulf %189, %195 : vector<2x32xf32>
    %203 = arith.addf %201, %202 : vector<2x32xf32>
    %204 = math.tanh %203 : vector<2x32xf32>
    %205 = arith.mulf %200, %204 : vector<2x32xf32>
    %c6 = arith.constant 6 : index
    %c0_78 = arith.constant 0 : index
    %c0_79 = arith.constant 0 : index
    %206 = vector.load %arg11[%c6, %c0_78, %c0_79] : memref<8x2x32xf32, #tpu.memory_space<vmem>>, vector<1x2x32xf32>
    %207 = vector.shape_cast %206 : vector<1x2x32xf32> to vector<2x32xf32>
    %208 = vector.shape_cast %205 : vector<2x32xf32> to vector<1x2x32xf32>
    tpu.vector_store %arg11[%c6, %c0_78, %c0_79], %208 {strides = array<i32>} : memref<8x2x32xf32, #tpu.memory_space<vmem>>, vector<1x2x32xf32>,
    %209 = vector.extract_strided_slice %9 {offsets = [14, 0], sizes = [2, 128], strides = [1, 1]} : vector<16x128xf32> to vector<2x128xf32>
    %cst_80 = arith.constant dense<0.000000e+00> : vector<2x128xf32>
    %210 = tpu.matmul %205, %10, %cst_80 {dimension_numbers = #tpu.dot_dimension_numbers<[1], [0], [0], [1], [0, 0, 1, 1], [], []>} : vector<2x32xf32>, vector<32x128xf32>, vector<2x128xf32> -> vector<2x128xf32>
    %211 = arith.addf %209, %210 : vector<2x128xf32>
    %212 = math.tanh %211 : vector<2x128xf32>
    %213 = vector.extract_strided_slice %212 {offsets = [0, 0], sizes = [2, 32], strides = [1, 1]} : vector<2x128xf32> to vector<2x32xf32>
    %cst_81 = arith.constant 1.000000e+00 : f32
    %214 = vector.broadcast %cst_81 : f32 to vector<2x32xf32>
    %215 = arith.addf %213, %214 : vector<2x32xf32>
    %cst_82 = arith.constant 5.000000e-01 : f32
    %216 = vector.broadcast %cst_82 : f32 to vector<2x32xf32>
    %217 = arith.mulf %216, %215 : vector<2x32xf32>
    %218 = vector.extract_strided_slice %212 {offsets = [0, 32], sizes = [2, 32], strides = [1, 1]} : vector<2x128xf32> to vector<2x32xf32>
    %cst_83 = arith.constant 1.000000e+00 : f32
    %219 = vector.broadcast %cst_83 : f32 to vector<2x32xf32>
    %220 = arith.addf %218, %219 : vector<2x32xf32>
    %cst_84 = arith.constant 5.000000e-01 : f32
    %221 = vector.broadcast %cst_84 : f32 to vector<2x32xf32>
    %222 = arith.mulf %221, %220 : vector<2x32xf32>
    %223 = vector.extract_strided_slice %212 {offsets = [0, 64], sizes = [2, 32], strides = [1, 1]} : vector<2x128xf32> to vector<2x32xf32>
    %224 = vector.extract_strided_slice %212 {offsets = [0, 96], sizes = [2, 32], strides = [1, 1]} : vector<2x128xf32> to vector<2x32xf32>
    %cst_85 = arith.constant 1.000000e+00 : f32
    %225 = vector.broadcast %cst_85 : f32 to vector<2x32xf32>
    %226 = arith.addf %224, %225 : vector<2x32xf32>
    %cst_86 = arith.constant 5.000000e-01 : f32
    %227 = vector.broadcast %cst_86 : f32 to vector<2x32xf32>
    %228 = arith.mulf %227, %226 : vector<2x32xf32>
    %229 = arith.mulf %222, %203 : vector<2x32xf32>
    %230 = arith.mulf %217, %223 : vector<2x32xf32>
    %231 = arith.addf %229, %230 : vector<2x32xf32>
    %232 = math.tanh %231 : vector<2x32xf32>
    %233 = arith.mulf %228, %232 : vector<2x32xf32>
    %c7 = arith.constant 7 : index
    %c0_87 = arith.constant 0 : index
    %c0_88 = arith.constant 0 : index
    %234 = vector.load %arg11[%c7, %c0_87, %c0_88] : memref<8x2x32xf32, #tpu.memory_space<vmem>>, vector<1x2x32xf32>
    %235 = vector.shape_cast %234 : vector<1x2x32xf32> to vector<2x32xf32>
    %236 = vector.shape_cast %233 : vector<2x32xf32> to vector<1x2x32xf32>
    tpu.vector_store %arg11[%c7, %c0_87, %c0_88], %236 {strides = array<i32>} : memref<8x2x32xf32, #tpu.memory_space<vmem>>, vector<1x2x32xf32>,
    %237 = tpu.iota {dimensions = array<i32: 1>} : vector<2x32xi32>
    %c16_i32 = arith.constant 16 : i32
    %238 = vector.broadcast %c16_i32 : i32 to vector<2x32xi32>
    %239 = arith.cmpi slt, %237, %238 : vector<2x32xi32>
    %c0_89 = arith.constant 0 : index
    %c0_90 = arith.constant 0 : index
    %c0_91 = arith.constant 0 : index
    %240 = vector.load %arg11[%c0_89, %c0_90, %c0_91] : memref<8x2x32xf32, #tpu.memory_space<vmem>>, vector<1x2x32xf32>
    %241 = vector.shape_cast %240 : vector<1x2x32xf32> to vector<2x32xf32>
    %c7_92 = arith.constant 7 : index
    %c0_93 = arith.constant 0 : index
    %c0_94 = arith.constant 0 : index
    %242 = vector.load %arg11[%c7_92, %c0_93, %c0_94] : memref<8x2x32xf32, #tpu.memory_space<vmem>>, vector<1x2x32xf32>
    %243 = vector.shape_cast %242 : vector<1x2x32xf32> to vector<2x32xf32>
    %244 = arith.select %239, %241, %243 : vector<2x32xi1>, vector<2x32xf32>
    %c0_95 = arith.constant 0 : index
    %c0_96 = arith.constant 0 : index
    %c0_97 = arith.constant 0 : index
    %245 = vector.load %arg8[%c0_95, %c0_96, %c0_97] : memref<8x2x32xf32, #tpu.memory_space<vmem>>, vector<1x2x32xf32>
    %246 = vector.shape_cast %245 : vector<1x2x32xf32> to vector<2x32xf32>
    %247 = vector.shape_cast %244 : vector<2x32xf32> to vector<1x2x32xf32>
    tpu.vector_store %arg8[%c0_95, %c0_96, %c0_97], %247 {strides = array<i32>} : memref<8x2x32xf32, #tpu.memory_space<vmem>>, vector<1x2x32xf32>,
    %c1_98 = arith.constant 1 : index
    %c0_99 = arith.constant 0 : index
    %c0_100 = arith.constant 0 : index
    %248 = vector.load %arg11[%c1_98, %c0_99, %c0_100] : memref<8x2x32xf32, #tpu.memory_space<vmem>>, vector<1x2x32xf32>
    %249 = vector.shape_cast %248 : vector<1x2x32xf32> to vector<2x32xf32>
    %c6_101 = arith.constant 6 : index
    %c0_102 = arith.constant 0 : index
    %c0_103 = arith.constant 0 : index
    %250 = vector.load %arg11[%c6_101, %c0_102, %c0_103] : memref<8x2x32xf32, #tpu.memory_space<vmem>>, vector<1x2x32xf32>
    %251 = vector.shape_cast %250 : vector<1x2x32xf32> to vector<2x32xf32>
    %252 = arith.select %239, %249, %251 : vector<2x32xi1>, vector<2x32xf32>
    %c1_104 = arith.constant 1 : index
    %c0_105 = arith.constant 0 : index
    %c0_106 = arith.constant 0 : index
    %253 = vector.load %arg8[%c1_104, %c0_105, %c0_106] : memref<8x2x32xf32, #tpu.memory_space<vmem>>, vector<1x2x32xf32>
    %254 = vector.shape_cast %253 : vector<1x2x32xf32> to vector<2x32xf32>
    %255 = vector.shape_cast %252 : vector<2x32xf32> to vector<1x2x32xf32>
    tpu.vector_store %arg8[%c1_104, %c0_105, %c0_106], %255 {strides = array<i32>} : memref<8x2x32xf32, #tpu.memory_space<vmem>>, vector<1x2x32xf32>,
    %c2_107 = arith.constant 2 : index
    %c0_108 = arith.constant 0 : index
    %c0_109 = arith.constant 0 : index
    %256 = vector.load %arg11[%c2_107, %c0_108, %c0_109] : memref<8x2x32xf32, #tpu.memory_space<vmem>>, vector<1x2x32xf32>
    %257 = vector.shape_cast %256 : vector<1x2x32xf32> to vector<2x32xf32>
    %c5_110 = arith.constant 5 : index
    %c0_111 = arith.constant 0 : index
    %c0_112 = arith.constant 0 : index
    %258 = vector.load %arg11[%c5_110, %c0_111, %c0_112] : memref<8x2x32xf32, #tpu.memory_space<vmem>>, vector<1x2x32xf32>
    %259 = vector.shape_cast %258 : vector<1x2x32xf32> to vector<2x32xf32>
    %260 = arith.select %239, %257, %259 : vector<2x32xi1>, vector<2x32xf32>
    %c2_113 = arith.constant 2 : index
    %c0_114 = arith.constant 0 : index
    %c0_115 = arith.constant 0 : index
    %261 = vector.load %arg8[%c2_113, %c0_114, %c0_115] : memref<8x2x32xf32, #tpu.memory_space<vmem>>, vector<1x2x32xf32>
    %262 = vector.shape_cast %261 : vector<1x2x32xf32> to vector<2x32xf32>
    %263 = vector.shape_cast %260 : vector<2x32xf32> to vector<1x2x32xf32>
    tpu.vector_store %arg8[%c2_113, %c0_114, %c0_115], %263 {strides = array<i32>} : memref<8x2x32xf32, #tpu.memory_space<vmem>>, vector<1x2x32xf32>,
    %c3_116 = arith.constant 3 : index
    %c0_117 = arith.constant 0 : index
    %c0_118 = arith.constant 0 : index
    %264 = vector.load %arg11[%c3_116, %c0_117, %c0_118] : memref<8x2x32xf32, #tpu.memory_space<vmem>>, vector<1x2x32xf32>
    %265 = vector.shape_cast %264 : vector<1x2x32xf32> to vector<2x32xf32>
    %c4_119 = arith.constant 4 : index
    %c0_120 = arith.constant 0 : index
    %c0_121 = arith.constant 0 : index
    %266 = vector.load %arg11[%c4_119, %c0_120, %c0_121] : memref<8x2x32xf32, #tpu.memory_space<vmem>>, vector<1x2x32xf32>
    %267 = vector.shape_cast %266 : vector<1x2x32xf32> to vector<2x32xf32>
    %268 = arith.select %239, %265, %267 : vector<2x32xi1>, vector<2x32xf32>
    %c3_122 = arith.constant 3 : index
    %c0_123 = arith.constant 0 : index
    %c0_124 = arith.constant 0 : index
    %269 = vector.load %arg8[%c3_122, %c0_123, %c0_124] : memref<8x2x32xf32, #tpu.memory_space<vmem>>, vector<1x2x32xf32>
    %270 = vector.shape_cast %269 : vector<1x2x32xf32> to vector<2x32xf32>
    %271 = vector.shape_cast %268 : vector<2x32xf32> to vector<1x2x32xf32>
    tpu.vector_store %arg8[%c3_122, %c0_123, %c0_124], %271 {strides = array<i32>} : memref<8x2x32xf32, #tpu.memory_space<vmem>>, vector<1x2x32xf32>,
    %c4_125 = arith.constant 4 : index
    %c0_126 = arith.constant 0 : index
    %c0_127 = arith.constant 0 : index
    %272 = vector.load %arg11[%c4_125, %c0_126, %c0_127] : memref<8x2x32xf32, #tpu.memory_space<vmem>>, vector<1x2x32xf32>
    %273 = vector.shape_cast %272 : vector<1x2x32xf32> to vector<2x32xf32>
    %c3_128 = arith.constant 3 : index
    %c0_129 = arith.constant 0 : index
    %c0_130 = arith.constant 0 : index
    %274 = vector.load %arg11[%c3_128, %c0_129, %c0_130] : memref<8x2x32xf32, #tpu.memory_space<vmem>>, vector<1x2x32xf32>
    %275 = vector.shape_cast %274 : vector<1x2x32xf32> to vector<2x32xf32>
    %276 = arith.select %239, %273, %275 : vector<2x32xi1>, vector<2x32xf32>
    %c4_131 = arith.constant 4 : index
    %c0_132 = arith.constant 0 : index
    %c0_133 = arith.constant 0 : index
    %277 = vector.load %arg8[%c4_131, %c0_132, %c0_133] : memref<8x2x32xf32, #tpu.memory_space<vmem>>, vector<1x2x32xf32>
    %278 = vector.shape_cast %277 : vector<1x2x32xf32> to vector<2x32xf32>
    %279 = vector.shape_cast %276 : vector<2x32xf32> to vector<1x2x32xf32>
    tpu.vector_store %arg8[%c4_131, %c0_132, %c0_133], %279 {strides = array<i32>} : memref<8x2x32xf32, #tpu.memory_space<vmem>>, vector<1x2x32xf32>,
    %c5_134 = arith.constant 5 : index
    %c0_135 = arith.constant 0 : index
    %c0_136 = arith.constant 0 : index
    %280 = vector.load %arg11[%c5_134, %c0_135, %c0_136] : memref<8x2x32xf32, #tpu.memory_space<vmem>>, vector<1x2x32xf32>
    %281 = vector.shape_cast %280 : vector<1x2x32xf32> to vector<2x32xf32>
    %c2_137 = arith.constant 2 : index
    %c0_138 = arith.constant 0 : index
    %c0_139 = arith.constant 0 : index
    %282 = vector.load %arg11[%c2_137, %c0_138, %c0_139] : memref<8x2x32xf32, #tpu.memory_space<vmem>>, vector<1x2x32xf32>
    %283 = vector.shape_cast %282 : vector<1x2x32xf32> to vector<2x32xf32>
    %284 = arith.select %239, %281, %283 : vector<2x32xi1>, vector<2x32xf32>
    %c5_140 = arith.constant 5 : index
    %c0_141 = arith.constant 0 : index
    %c0_142 = arith.constant 0 : index
    %285 = vector.load %arg8[%c5_140, %c0_141, %c0_142] : memref<8x2x32xf32, #tpu.memory_space<vmem>>, vector<1x2x32xf32>
    %286 = vector.shape_cast %285 : vector<1x2x32xf32> to vector<2x32xf32>
    %287 = vector.shape_cast %284 : vector<2x32xf32> to vector<1x2x32xf32>
    tpu.vector_store %arg8[%c5_140, %c0_141, %c0_142], %287 {strides = array<i32>} : memref<8x2x32xf32, #tpu.memory_space<vmem>>, vector<1x2x32xf32>,
    %c6_143 = arith.constant 6 : index
    %c0_144 = arith.constant 0 : index
    %c0_145 = arith.constant 0 : index
    %288 = vector.load %arg11[%c6_143, %c0_144, %c0_145] : memref<8x2x32xf32, #tpu.memory_space<vmem>>, vector<1x2x32xf32>
    %289 = vector.shape_cast %288 : vector<1x2x32xf32> to vector<2x32xf32>
    %c1_146 = arith.constant 1 : index
    %c0_147 = arith.constant 0 : index
    %c0_148 = arith.constant 0 : index
    %290 = vector.load %arg11[%c1_146, %c0_147, %c0_148] : memref<8x2x32xf32, #tpu.memory_space<vmem>>, vector<1x2x32xf32>
    %291 = vector.shape_cast %290 : vector<1x2x32xf32> to vector<2x32xf32>
    %292 = arith.select %239, %289, %291 : vector<2x32xi1>, vector<2x32xf32>
    %c6_149 = arith.constant 6 : index
    %c0_150 = arith.constant 0 : index
    %c0_151 = arith.constant 0 : index
    %293 = vector.load %arg8[%c6_149, %c0_150, %c0_151] : memref<8x2x32xf32, #tpu.memory_space<vmem>>, vector<1x2x32xf32>
    %294 = vector.shape_cast %293 : vector<1x2x32xf32> to vector<2x32xf32>
    %295 = vector.shape_cast %292 : vector<2x32xf32> to vector<1x2x32xf32>
    tpu.vector_store %arg8[%c6_149, %c0_150, %c0_151], %295 {strides = array<i32>} : memref<8x2x32xf32, #tpu.memory_space<vmem>>, vector<1x2x32xf32>,
    %c7_152 = arith.constant 7 : index
    %c0_153 = arith.constant 0 : index
    %c0_154 = arith.constant 0 : index
    %296 = vector.load %arg11[%c7_152, %c0_153, %c0_154] : memref<8x2x32xf32, #tpu.memory_space<vmem>>, vector<1x2x32xf32>
    %297 = vector.shape_cast %296 : vector<1x2x32xf32> to vector<2x32xf32>
    %c0_155 = arith.constant 0 : index
    %c0_156 = arith.constant 0 : index
    %c0_157 = arith.constant 0 : index
    %298 = vector.load %arg11[%c0_155, %c0_156, %c0_157] : memref<8x2x32xf32, #tpu.memory_space<vmem>>, vector<1x2x32xf32>
    %299 = vector.shape_cast %298 : vector<1x2x32xf32> to vector<2x32xf32>
    %300 = arith.select %239, %297, %299 : vector<2x32xi1>, vector<2x32xf32>
    %c7_158 = arith.constant 7 : index
    %c0_159 = arith.constant 0 : index
    %c0_160 = arith.constant 0 : index
    %301 = vector.load %arg8[%c7_158, %c0_159, %c0_160] : memref<8x2x32xf32, #tpu.memory_space<vmem>>, vector<1x2x32xf32>
    %302 = vector.shape_cast %301 : vector<1x2x32xf32> to vector<2x32xf32>
    %303 = vector.shape_cast %300 : vector<2x32xf32> to vector<1x2x32xf32>
    tpu.vector_store %arg8[%c7_158, %c0_159, %c0_160], %303 {strides = array<i32>} : memref<8x2x32xf32, #tpu.memory_space<vmem>>, vector<1x2x32xf32>,
    %c0_161 = arith.constant 0 : index
    %c0_162 = arith.constant 0 : index
    %304 = vector.load %arg9[%c0_161, %c0_162] : memref<2x32xf32, #tpu.memory_space<vmem>>, vector<2x32xf32>
    tpu.vector_store %arg9[%c0_161, %c0_162], %233 {strides = array<i32>} : memref<2x32xf32, #tpu.memory_space<vmem>>, vector<2x32xf32>,
    %c0_163 = arith.constant 0 : index
    %c0_164 = arith.constant 0 : index
    %305 = vector.load %arg10[%c0_163, %c0_164] : memref<2x32xf32, #tpu.memory_space<vmem>>, vector<2x32xf32>
    tpu.vector_store %arg10[%c0_163, %c0_164], %231 {strides = array<i32>} : memref<2x32xf32, #tpu.memory_space<vmem>>, vector<2x32xf32>,
    return
  }
}

</mosaic_0001>

<bundles_post_ra>
// kernel: _forward_impl.1
= control target key start
LH: loop header
LB: loop body
LE: loop exit
PB: predicated region body
PF: predicated region fallthrough
CT: control target
= control target key end

     0   :  { %vm44_vm0 = vcmask 261120   ;;  %s684_s21 = smov 64   ;;  %vm167_vm1 = vcmask 254976   ;;  %vm223_vm2 = vcmask 257026   ;;  %vm282_vm3 = vcmask 259076   ;;  %s971_s4 = inlined_call_operand.vmem [shape: f32[32,128], index: 4, kind: input, shape index: {}]   ;;  %s972_s3 = inlined_call_operand.vmem [shape: f32[32,128], index: 3, kind: input, shape index: {}]   ;;  %s973_s2 = inlined_call_operand.vmem [shape: f32[32,128], index: 2, kind: input, shape index: {}]   ;;  %s974_s6 = inlined_call_operand.vmem [shape: f32[2,32], index: 6, kind: input, shape index: {}]   ;;  %s975_s1 = inlined_call_operand.vmem [shape: f32[16,32], index: 1, kind: input, shape index: {}]   ;;  %s976_s0 = inlined_call_operand.vmem [shape: f32[16,32], index: 0, kind: input, shape index: {}]   ;;  %s977_s5 = inlined_call_operand.vmem [shape: f32[1,128], index: 5, kind: input, shape index: {}]   ;;  %s978_s7 = inlined_call_operand.vmem [shape: f32[2,32], index: 7, kind: input, shape index: {}]   ;;  %s979_s8 = inlined_call_operand.vmem [shape: f32[8,2,32], index: 8, kind: output, shape index: {0}]   ;;  %s980_s10 = inlined_call_operand.vmem [shape: f32[2,32], index: 10, kind: output, shape index: {2}]   ;;  %s981_s9 = inlined_call_operand.vmem [shape: f32[2,32], index: 9, kind: output, shape index: {1}]  }
   0x1   :  { %v745_v0 = vld [vmem:[%s971_s4 + $0x18] sm:$0xff]  ;;  %v757_v3 = vld [vmem:[%s971_s4 + $0x10] sm:$0xff]  ;;  %v768_v6 = vld [vmem:[%s971_s4 + $0x8] sm:$0xff]  ;;  %vm341_vm5 = vcmask 261126  }
   0x2   :  { %v43_v1 = vld [vmem:[%s972_s3 + $0x18] sm:$0xff]  ;;  %130 = vmatpush.msra.mxu2 %v745_v0  ;;  %v42_v4 = vld [vmem:[%s972_s3 + $0x10] sm:$0xff]  ;;  %v41_v7 = vld [vmem:[%s972_s3 + $0x8] sm:$0xff]  ;;  %183 = vmatpush.msra.mxu3 %v745_v0 }
   0x3   :  { %v37_v2 = vld [vmem:[%s973_s2 + $0x18] sm:$0xff]  ;;  %63 = vmatpush.msra.mxu0 %v43_v1  ;;  %v36_v5 = vld [vmem:[%s973_s2 + $0x10] sm:$0xff]  ;;  %v35_v8 = vld [vmem:[%s973_s2 + $0x8] sm:$0xff] }
   0x4   :  { %92 = vmatpush.msra.mxu1 %v37_v2  ;;  %131 = vmatpush.msra.mxu2 %v757_v3  ;;  %v781_v9 = vld [vmem:[%s971_s4] sm:$0xff] }
   0x5   :  { %64 = vmatpush.msra.mxu0 %v42_v4  ;;  %v40_v10 = vld [vmem:[%s972_s3] sm:$0xff]  ;;  %184 = vmatpush.msra.mxu3 %v757_v3 }
   0x6   :  { %93 = vmatpush.msra.mxu1 %v36_v5  ;;  %132 = vmatpush.msra.mxu2 %v768_v6  ;;  %v113_v11 = vld [vmem:[%s974_s6] sm:$0x3] }
   0x7   :  { %65 = vmatpush.msra.mxu0 %v41_v7  ;;  %v34_v12 = vld [vmem:[%s973_s2] sm:$0xff]  ;;  %185 = vmatpush.msra.mxu3 %v768_v6 }
   0x8   :  { %94 = vmatpush.msra.mxu1 %v35_v8  ;;  %v38_v13 = vld [vmem:[%s975_s1] sm:$0xff]  ;;  %133 = vmatpush.msra.mxu2 %v781_v9 }
   0x9   :  { %v32_v14 = vld [vmem:[%s976_s0] sm:$0xff]  ;;  %66 = vmatpush.msra.mxu0 %v40_v10  ;;  %633 = vmatmul.msk.f32.vlgmr.msra.gmra.mxu2 %vm44_vm0, %v113_v11 }
   0xa   :  { %95 = vmatpush.msra.mxu1 %v34_v12  ;;  %629 = vmatmul.msk.f32.vlgmr.msra.gmra.mxu0 %vm44_vm0, %v38_v13  ;;  %v829_v15 = vld [vmem:[%s977_s5] ss:$0 sm:$0xff]  ;;  %s685_s5 = smov 32  }
   0xb   :  { %631 = vmatmul.msk.f32.vlgmr.msra.gmra.mxu1 %vm44_vm0, %v32_v14  ;;  %186 = vmatpush.msra.mxu3 %v781_v9  ;;  %v114_v23 = vld [vmem:[%s978_s7] sm:$0x3] }
   0xc   :  { %242 = vmatpush.msrb.mxu2 %v745_v0  ;;  %360 = vmatpush.msrb.mxu0 %v745_v0 }
   0xd   :  { %301 = vmatpush.msrb.mxu3 %v745_v0  ;;  %412 = vmatpush.msrb.mxu1 %v745_v0 }
   0xe   :  { %243 = vmatpush.msrb.mxu2 %v757_v3  ;;  %361 = vmatpush.msrb.mxu0 %v757_v3 }
   0xf   :  { %302 = vmatpush.msrb.mxu3 %v757_v3  ;;  %413 = vmatpush.msrb.mxu1 %v757_v3 }
  0x10   :  { %244 = vmatpush.msrb.mxu2 %v768_v6  ;;  %362 = vmatpush.msrb.mxu0 %v768_v6 }
  0x11   :  { %303 = vmatpush.msrb.mxu3 %v768_v6  ;;  %414 = vmatpush.msrb.mxu1 %v768_v6 }
  0x12   :  { %245 = vmatpush.msrb.mxu2 %v781_v9  ;;  %363 = vmatpush.msrb.mxu0 %v781_v9 }
  0x13   :  { %304 = vmatpush.msrb.mxu3 %v781_v9  ;;  %415 = vmatpush.msrb.mxu1 %v781_v9 }
  0x14   :  { %470 = vmatpush.msra.mxu2 %v745_v0 }
  0x16   :  { %471 = vmatpush.msra.mxu2 %v757_v3 }
  0x18   :  { %472 = vmatpush.msra.mxu2 %v768_v6 }
  0x1a   :  { %473 = vmatpush.msra.mxu2 %v781_v9 }
  0x87   :  { %v68_v16 = vpop.f32.mrf.mxu0 }
  0x88   :  { %v97_v17 = vpop.f32.mrf.mxu1 }
  0x89   :  { %v98_v18 = vadd.f32 %v97_v17, %v68_v16 }
  0x8b   :  { %v832_v19 = vadd.f32 %v829_v15, %v98_v18 }
  0x8c   :  { %v135_v20 = vpop.f32.mrf.mxu2 }
  0x8d   :  { %v138_v21 = vadd.f32 %v135_v20, %v832_v19 }
  0x8f   :  { %652 = vtanh.f32 %v138_v21  ;;  %v33_v21 = vld [vmem:[%s976_s0 + $0x8] sm:$0xff]  ;;  %s686_s0 = smov 96  }
  0x90   :  { %632 = vmatmul.msk.f32.gmra.mxu1 %vm44_vm0, %v33_v21 }
  0x95   :  { %v653_v22 = vpop.eup %652 }
  0x96   :  { %148 = vrot.lane.b32.xlu0 %v653_v22, %s684_s21  ;;  %v140_v24 = vadd.f32 1.0, %v653_v22 }
  0x98   :  { %v141_v25 = vmul.f32 0.5, %v140_v24 }
  0x9e   :  { %143 = vrot.lane.b32.xlu0 %v114_v23, %s685_s5 }
 0x108   :  { %v149_v26 = vpop.permute.xlu0 %148 }
 0x109   :  { %v151_v27 = vmul.f32 %v149_v26, %v141_v25 }
 0x10b   :  { %153 = vrot.lane.b32.xlu1 %v151_v27, %s685_s5 }
 0x10d   :  { %v100_v27 = vpop.f32.mrf.mxu1 }
 0x110   :  { %v144_v28 = vpop.permute.xlu0 %143 }
 0x111   :  { %v146_v29 = vmul.f32 %v144_v28, %v141_v25 }
 0x17d   :  { %v154_v30 = vpop.permute.xlu1 %153 }
 0x17e   :  { %v156_v31 = vadd.f32 %v154_v30, %v146_v29 }
 0x180   :  { %654 = vtanh.f32 %v156_v31  ;;  %v199_v44 = vrot.slane %v156_v31, 6 }
 0x186   :  { %v655_v32 = vpop.eup %654 }
 0x187   :  { %159 = vrot.lane.b32.xlu1 %v655_v32, %s684_s21 }
 0x1f9   :  { %v160_v33 = vpop.permute.xlu1 %159 }
 0x1fa   :  { %v162_v34 = vmul.f32 %v160_v33, %v141_v25 }
 0x1fc   :  { %164 = vrot.lane.b32.xlu2 %v162_v34, %s685_s5 }
 0x256   :  { %v165_v35 = vpop.permute.xlu2 %164 }
 0x257   :  { %168 = vst.msk [vmem:[#allocation2] sm:$0x3] %vm167_vm1, %v165_v35  ;;  %634 = vmatmul.msk.f32.vlgmr.msra.gmra.mxu3 %vm44_vm0, %v165_v35 }
 0x258   :  { %528 = vmatpush.msra.mxu3 %v745_v0 }
 0x25a   :  { %529 = vmatpush.msra.mxu3 %v757_v3 }
 0x25c   :  { %530 = vmatpush.msra.mxu3 %v768_v6 }
 0x25e   :  { %531 = vmatpush.msra.mxu3 %v781_v9 }
 0x2da   :  { %v188_v36 = vpop.f32.mrf.mxu3 }
 0x2db   :  { %v192_v37 = vrot.slane %v188_v36, 6 }
 0x2dd   :  { %v194_v38 = vadd.f32 %v192_v37, %v832_v19 }
 0x2df   :  { %656 = vtanh.f32 %v194_v38 }
 0x2e5   :  { %v657_v39 = vpop.eup %656 }
 0x2e6   :  { %203 = vrot.lane.b32.xlu2 %v657_v39, %s684_s21  ;;  %v196_v40 = vadd.f32 1.0, %v657_v39 }
 0x2e8   :  { %v197_v41 = vmul.f32 0.5, %v196_v40 }
 0x2ea   :  { %v201_v45 = vmul.f32 %v199_v44, %v197_v41 }
 0x340   :  { %v204_v42 = vpop.permute.xlu2 %203 }
 0x341   :  { %v206_v43 = vmul.f32 %v204_v42, %v197_v41 }
 0x343   :  { %208 = vrot.lane.b32.xlu0 %v206_v43, %s685_s5 }
 0x3b5   :  { %v209_v46 = vpop.permute.xlu0 %208 }
 0x3b6   :  { %v211_v47 = vadd.f32 %v209_v46, %v201_v45 }
 0x3b8   :  { %658 = vtanh.f32 %v211_v47  ;;  %v258_v61 = vrot.slane %v211_v47, 6 }
 0x3be   :  { %v659_v48 = vpop.eup %658 }
 0x3bf   :  { %214 = vrot.lane.b32.xlu1 %v659_v48, %s684_s21 }
 0x431   :  { %v215_v49 = vpop.permute.xlu1 %214 }
 0x432   :  { %v853_v50 = vmul.f32 %v215_v49, %v197_v41 }
 0x434   :  { %v225_v51 = vrot.slane %v853_v50, 2 }
 0x436   :  { %226 = vrot.lane.b32.xlu2 %v225_v51, %s685_s5 }
 0x490   :  { %v227_v52 = vpop.permute.xlu2 %226 }
 0x491   :  { %635 = vmatmul.msk.f32.vlgmr.msrb.gmra.mxu2 %vm44_vm0, %v227_v52 }
 0x514   :  { %v247_v53 = vpop.f32.mrf.mxu2 }
 0x515   :  { %v251_v54 = vrot.slane %v247_v53, 4 }
 0x517   :  { %v253_v55 = vadd.f32 %v251_v54, %v832_v19 }
 0x519   :  { %660 = vtanh.f32 %v253_v55 }
 0x51f   :  { %v661_v56 = vpop.eup %660 }
 0x520   :  { %262 = vrot.lane.b32.xlu0 %v661_v56, %s684_s21  ;;  %v255_v57 = vadd.f32 1.0, %v661_v56 }
 0x522   :  { %v256_v58 = vmul.f32 0.5, %v255_v57 }
 0x524   :  { %v260_v62 = vmul.f32 %v258_v61, %v256_v58 }
 0x592   :  { %v263_v59 = vpop.permute.xlu0 %262 }
 0x593   :  { %v265_v60 = vmul.f32 %v263_v59, %v256_v58 }
 0x595   :  { %267 = vrot.lane.b32.xlu1 %v265_v60, %s685_s5 }
 0x607   :  { %v268_v63 = vpop.permute.xlu1 %267 }
 0x608   :  { %v270_v0 = vadd.f32 %v268_v63, %v260_v62 }
 0x60a   :  { %662 = vtanh.f32 %v270_v0  ;;  %v317_v14 = vrot.slane %v270_v0, 6 }
 0x610   :  { %v663_v1 = vpop.eup %662 }
 0x611   :  { %273 = vrot.lane.b32.xlu2 %v663_v1, %s684_s21 }
 0x66b   :  { %v274_v2 = vpop.permute.xlu2 %273 }
 0x66c   :  { %v862_v3 = vmul.f32 %v274_v2, %v256_v58 }
 0x66e   :  { %v284_v4 = vrot.slane %v862_v3, 4 }
 0x670   :  { %285 = vrot.lane.b32.xlu0 %v284_v4, %s685_s5 }
 0x6e2   :  { %v286_v5 = vpop.permute.xlu0 %285 }
 0x6e3   :  { %636 = vmatmul.msk.f32.vlgmr.msrb.gmra.mxu3 %vm44_vm0, %v286_v5 }
 0x766   :  { %v306_v6 = vpop.f32.mrf.mxu3 }
 0x767   :  { %v310_v7 = vrot.slane %v306_v6, 2 }
 0x769   :  { %v312_v8 = vadd.f32 %v310_v7, %v832_v19  ;;  %v39_v19 = vld [vmem:[%s975_s1 + $0x8] sm:$0xff] }
 0x76a   :  { %630 = vmatmul.msk.f32.gmra.mxu0 %vm44_vm0, %v39_v19 }
 0x76b   :  { %664 = vtanh.f32 %v312_v8 }
 0x771   :  { %v665_v9 = vpop.eup %664 }
 0x772   :  { %321 = vrot.lane.b32.xlu1 %v665_v9, %s684_s21  ;;  %v314_v10 = vadd.f32 1.0, %v665_v9 }
 0x774   :  { %v315_v11 = vmul.f32 0.5, %v314_v10 }
 0x776   :  { %v319_v16 = vmul.f32 %v317_v14, %v315_v11 }
 0x7e4   :  { %v322_v12 = vpop.permute.xlu1 %321 }
 0x7e5   :  { %v324_v13 = vmul.f32 %v322_v12, %v315_v11 }
 0x7e7   :  { %326 = vrot.lane.b32.xlu2 %v324_v13, %s685_s5  ;;  %v71_v26 = vpop.f32.mrf.mxu0 }
 0x7e8   :  { %v101_v28 = vadd.f32 %v100_v27, %v71_v26 }
 0x7ea   :  { %v885_v29 = vadd.f32 %v829_v15, %v101_v28 }
 0x841   :  { %v327_v17 = vpop.permute.xlu2 %326 }
 0x842   :  { %v329_v18 = vadd.f32 %v327_v17, %v319_v16 }
 0x844   :  { %666 = vtanh.f32 %v329_v18  ;;  %v373_v37 = vrot.slane %v329_v18, 6 }
 0x84a   :  { %v667_v20 = vpop.eup %666 }
 0x84b   :  { %332 = vrot.lane.b32.xlu0 %v667_v20, %s684_s21 }
 0x8bd   :  { %v333_v22 = vpop.permute.xlu0 %332 }
 0x8be   :  { %v879_v23 = vmul.f32 %v333_v22, %v315_v11 }
 0x8c0   :  { %v343_v24 = vrot.slane %v879_v23, 6 }
 0x8c2   :  { %344 = vrot.lane.b32.xlu1 %v343_v24, %s685_s5 }
 0x934   :  { %v345_v25 = vpop.permute.xlu1 %344 }
 0x935   :  { %637 = vmatmul.msk.f32.vlgmr.msrb.gmra.mxu0 %vm44_vm0, %v345_v25 }
 0x9b2   :  { %v365_v30 = vpop.f32.mrf.mxu0 }
 0x9b3   :  { %v368_v31 = vadd.f32 %v365_v30, %v885_v29 }
 0x9b5   :  { %668 = vtanh.f32 %v368_v31  ;;  %v569_v31 = vlaneseq }
 0x9bb   :  { %v669_v32 = vpop.eup %668 }
 0x9bc   :  { %377 = vrot.lane.b32.xlu2 %v669_v32, %s684_s21  ;;  %v370_v33 = vadd.f32 1.0, %v669_v32 }
 0x9be   :  { %v371_v34 = vmul.f32 0.5, %v370_v33 }
 0x9c0   :  { %v375_v38 = vmul.f32 %v373_v37, %v371_v34 }
 0xa16   :  { %v378_v35 = vpop.permute.xlu2 %377 }
 0xa17   :  { %v380_v36 = vmul.f32 %v378_v35, %v371_v34 }
 0xa19   :  { %382 = vrot.lane.b32.xlu0 %v380_v36, %s685_s5 }
 0xa8b   :  { %v383_v39 = vpop.permute.xlu0 %382 }
 0xa8c   :  { %v385_v40 = vadd.f32 %v383_v39, %v375_v38 }
 0xa8e   :  { %670 = vtanh.f32 %v385_v40  ;;  %v428_v53 = vrot.slane %v385_v40, 6 }
 0xa94   :  { %v671_v15 = vpop.eup %670 }
 0xa95   :  { %388 = vrot.lane.b32.xlu1 %v671_v15, %s684_s21 }
 0xb07   :  { %v389_v41 = vpop.permute.xlu1 %388 }
 0xb08   :  { %v391_v42 = vmul.f32 %v389_v41, %v371_v34  ;;  %v570_v34 = vand.u32 127, %v569_v31 }
 0xb0a   :  { %393 = vrot.lane.b32.xlu2 %v391_v42, %s685_s5  ;;  %vm571_vm4 = vcmp.lt.s32.totalorder %v570_v34, 16 }
 0xb64   :  { %v394_v43 = vpop.permute.xlu2 %393 }
 0xb65   :  { %397 = vst.msk [vmem:[#allocation2 + $0x8] sm:$0x3] %vm167_vm1, %v394_v43  ;;  %638 = vmatmul.msk.f32.vlgmr.msrb.gmra.mxu1 %vm44_vm0, %v394_v43 }
 0xbe2   :  { %v417_v44 = vpop.f32.mrf.mxu1 }
 0xbe3   :  { %v421_v45 = vrot.slane %v417_v44, 6 }
 0xbe5   :  { %v423_v46 = vadd.f32 %v421_v45, %v885_v29 }
 0xbe7   :  { %672 = vtanh.f32 %v423_v46 }
 0xbed   :  { %v673_v47 = vpop.eup %672 }
 0xbee   :  { %432 = vrot.lane.b32.xlu0 %v673_v47, %s684_s21  ;;  %v425_v48 = vadd.f32 1.0, %v673_v47 }
 0xbf0   :  { %v426_v49 = vmul.f32 0.5, %v425_v48 }
 0xbf2   :  { %v430_v54 = vmul.f32 %v428_v53, %v426_v49 }
 0xc60   :  { %v433_v51 = vpop.permute.xlu0 %432 }
 0xc61   :  { %v435_v52 = vmul.f32 %v433_v51, %v426_v49  ;;  %v591_v51 = vld [vmem:[#allocation2 + $0x8] sm:$0x3] }
 0xc63   :  { %437 = vrot.lane.b32.xlu1 %v435_v52, %s685_s5 }
 0xcd5   :  { %v438_v55 = vpop.permute.xlu1 %437 }
 0xcd6   :  { %v440_v56 = vadd.f32 %v438_v55, %v430_v54 }
 0xcd8   :  { %674 = vtanh.f32 %v440_v56  ;;  %v486_v7 = vrot.slane %v440_v56, 6 }
 0xcde   :  { %v675_v57 = vpop.eup %674 }
 0xcdf   :  { %443 = vrot.lane.b32.xlu2 %v675_v57, %s684_s21  ;;  %v572_v57 = vld [vmem:[#allocation2] sm:$0x3] }
 0xd39   :  { %v444_v58 = vpop.permute.xlu2 %443 }
 0xd3a   :  { %v446_v59 = vmul.f32 %v444_v58, %v426_v49  ;;  %v587_v49 = vld [vmem:[#allocation2 + $0x8] sm:$0x3]  ;;  %v607_v58 = vld [vmem:[#allocation2] sm:$0x3] }
 0xd3c   :  { %v453_v60 = vrot.slane %v446_v59, 2 }
 0xd3e   :  { %454 = vrot.lane.b32.xlu0 %v453_v60, %s685_s5 }
 0xdb0   :  { %v455_v61 = vpop.permute.xlu0 %454 }
 0xdb1   :  { %639 = vmatmul.msk.f32.vlgmr.msra.gmra.mxu2 %vm44_vm0, %v455_v61 }
 0xe34   :  { %v475_v62 = vpop.f32.mrf.mxu2 }
 0xe35   :  { %v479_v63 = vrot.slane %v475_v62, 4 }
 0xe37   :  { %v481_v0 = vadd.f32 %v479_v63, %v885_v29 }
 0xe39   :  { %676 = vtanh.f32 %v481_v0 }
 0xe3f   :  { %v677_v1 = vpop.eup %676 }
 0xe40   :  { %490 = vrot.lane.b32.xlu1 %v677_v1, %s684_s21  ;;  %v483_v2 = vadd.f32 1.0, %v677_v1 }
 0xe42   :  { %v484_v4 = vmul.f32 0.5, %v483_v2 }
 0xe44   :  { %v488_v8 = vmul.f32 %v486_v7, %v484_v4 }
 0xeb2   :  { %v491_v5 = vpop.permute.xlu1 %490 }
 0xeb3   :  { %v493_v6 = vmul.f32 %v491_v5, %v484_v4 }
 0xeb5   :  { %495 = vrot.lane.b32.xlu2 %v493_v6, %s685_s5 }
 0xf0f   :  { %v496_v9 = vpop.permute.xlu2 %495 }
 0xf10   :  { %v498_v10 = vadd.f32 %v496_v9, %v488_v8 }
 0xf12   :  { %678 = vtanh.f32 %v498_v10  ;;  %v544_v28 = vrot.slane %v498_v10, 6 }
 0xf18   :  { %v679_v11 = vpop.eup %678 }
 0xf19   :  { %501 = vrot.lane.b32.xlu0 %v679_v11, %s684_s21 }
 0xf8b   :  { %v502_v12 = vpop.permute.xlu0 %501 }
 0xf8c   :  { %v504_v13 = vmul.f32 %v502_v12, %v484_v4 }
 0xf8e   :  { %v511_v14 = vrot.slane %v504_v13, 4 }
 0xf90   :  { %512 = vrot.lane.b32.xlu1 %v511_v14, %s685_s5 }
0x1002   :  { %v513_v16 = vpop.permute.xlu1 %512 }
0x1003   :  { %640 = vmatmul.msk.f32.vlgmr.msra.gmra.mxu3 %vm44_vm0, %v513_v16 }
0x1086   :  { %v533_v17 = vpop.f32.mrf.mxu3 }
0x1087   :  { %v537_v18 = vrot.slane %v533_v17, 2 }
0x1089   :  { %v539_v20 = vadd.f32 %v537_v18, %v885_v29 }
0x108b   :  { %680 = vtanh.f32 %v539_v20 }
0x1091   :  { %v681_v19 = vpop.eup %680 }
0x1092   :  { %548 = vrot.lane.b32.xlu2 %v681_v19, %s684_s21  ;;  %v541_v21 = vadd.f32 1.0, %v681_v19 }
0x1094   :  { %v542_v22 = vmul.f32 0.5, %v541_v21 }
0x109a   :  { %219 = vrot.lane.b32.xlu2 %v853_v50, %s685_s5  ;;  %v546_v50 = vmul.f32 %v544_v28, %v542_v22 }
0x10a2   :  { %448 = vrot.lane.b32.xlu2 %v446_v59, %s685_s5 }
0x10ec   :  { %v549_v24 = vpop.permute.xlu2 %548 }
0x10ed   :  { %v551_v25 = vmul.f32 %v549_v24, %v542_v22 }
0x10ef   :  { %553 = vrot.lane.b32.xlu0 %v551_v25, %s685_s5 }
0x10f4   :  { %v220_v26 = vpop.permute.xlu2 %219 }
0x10f5   :  { %224 = vst.msk [vmem:[#allocation2] sm:$0xc] %vm223_vm2, %v220_v26 }
0x10f7   :  { %278 = vrot.lane.b32.xlu0 %v862_v3, %s685_s5 }
0x10fc   :  { %v449_v27 = vpop.permute.xlu2 %448  ;;  %v576_v15 = vld [vmem:[#allocation2 + $0x2] sm:$0x3] }
0x10fd   :  { %452 = vst.msk [vmem:[#allocation2 + $0x8] sm:$0xc] %vm223_vm2, %v449_v27  ;;  %v602_v41 = vld [vmem:[#allocation2 + $0x2] sm:$0x3] }
0x10ff   :  { %506 = vrot.lane.b32.xlu0 %v504_v13, %s685_s5 }
0x1104   :  { %v582_v3 = vld [vmem:[#allocation2 + $0xa] sm:$0x3] }
0x1105   :  { %v596_v35 = vld [vmem:[#allocation2 + $0xa] sm:$0x3] }
0x1161   :  { %v554_v29 = vpop.permute.xlu0 %553 }
0x1162   :  { %v556_v30 = vadd.f32 %v554_v29, %v546_v50 }
0x1164   :  { %682 = vtanh.f32 %v556_v30  ;;  %613 = vrot.lane.b32.xlu2 %v556_v30, %s686_s0 }
0x1169   :  { %v279_v32 = vpop.permute.xlu0 %278 }
0x116a   :  { %v683_v33 = vpop.eup %682  ;;  %283 = vst.msk [vmem:[#allocation2] sm:$0x30] %vm282_vm3, %v279_v32 }
0x116b   :  { %559 = vrot.lane.b32.xlu1 %v683_v33, %s684_s21 }
0x1171   :  { %v581_v36 = vld [vmem:[#allocation2 + $0x4] sm:$0x3]  ;;  %v507_v38 = vpop.permute.xlu0 %506 }
0x1172   :  { %v597_v37 = vld [vmem:[#allocation2 + $0x4] sm:$0x3]  ;;  %v583_v39 = vsel %vm571_vm4, %v581_v36, %v582_v3  ;;  %510 = vst.msk [vmem:[#allocation2 + $0x8] sm:$0x30] %vm282_vm3, %v507_v38 }
0x1173   :  { %v598_v40 = vsel %vm571_vm4, %v596_v35, %v597_v37  ;;  %642 = vst.msk [vmem:[%s979_s8 + $0x4] sm:$0x3] %vm167_vm1, %v583_v39  ;;  %337 = vrot.lane.b32.xlu1 %v879_v23, %s685_s5 }
0x1174   :  { %645 = vst.msk [vmem:[%s979_s8 + $0xa] sm:$0x3] %vm167_vm1, %v598_v40 }
0x1179   :  { %v577_v42 = vld [vmem:[#allocation2 + $0xc] sm:$0x3] }
0x117a   :  { %v601_v43 = vld [vmem:[#allocation2 + $0xc] sm:$0x3]  ;;  %v578_v44 = vsel %vm571_vm4, %v576_v15, %v577_v42 }
0x117b   :  { %v603_v45 = vsel %vm571_vm4, %v601_v43, %v602_v41  ;;  %641 = vst.msk [vmem:[%s979_s8 + $0x2] sm:$0x3] %vm167_vm1, %v578_v44 }
0x117c   :  { %646 = vst.msk [vmem:[%s979_s8 + $0xc] sm:$0x3] %vm167_vm1, %v603_v45 }
0x11be   :  { %v614_v23 = vpop.permute.xlu2 %613 }
0x11bf   :  { %616 = vst.msk [vmem:[%s980_s10 - $0x6] sm:$0xc0] %vm341_vm5, %v614_v23 }
0x11dd   :  { %v560_v46 = vpop.permute.xlu1 %559 }
0x11de   :  { %v562_v47 = vmul.f32 %v560_v46, %v542_v22 }
0x11e0   :  { %564 = vrot.lane.b32.xlu1 %v562_v47, %s685_s5 }
0x11e5   :  { %v338_v48 = vpop.permute.xlu1 %337 }
0x11e6   :  { %342 = vst.msk [vmem:[#allocation2] sm:$0xc0] %vm341_vm5, %v338_v48 }
0x11ed   :  { %v586_v52 = vld [vmem:[#allocation2 + $0x6] sm:$0x3] }
0x11ee   :  { %v592_v53 = vld [vmem:[#allocation2 + $0x6] sm:$0x3]  ;;  %v588_v54 = vsel %vm571_vm4, %v586_v52, %v587_v49 }
0x11ef   :  { %v593_v55 = vsel %vm571_vm4, %v591_v51, %v592_v53  ;;  %643 = vst.msk [vmem:[%s979_s8 + $0x6] sm:$0x3] %vm167_vm1, %v588_v54 }
0x11f0   :  { %644 = vst.msk [vmem:[%s979_s8 + $0x8] sm:$0x3] %vm167_vm1, %v593_v55 }
0x1252   :  { %v565_v56 = vpop.permute.xlu1 %564 }
0x1253   :  { %568 = vst.msk [vmem:[#allocation2 + $0x8] sm:$0xc0] %vm341_vm5, %v565_v56 }
0x1254   :  { %611 = vst.msk [vmem:[%s981_s9 - $0x6] sm:$0xc0] %vm341_vm5, %v565_v56 }
0x125a   :  { %v573_v59 = vld [vmem:[#allocation2 + $0xe] sm:$0x3] }
0x125b   :  { %v606_v60 = vld [vmem:[#allocation2 + $0xe] sm:$0x3]  ;;  %v574_v61 = vsel %vm571_vm4, %v572_v57, %v573_v59 }
0x125c   :  { %v608_v62 = vsel %vm571_vm4, %v606_v60, %v607_v58  ;;  %575 = vst.msk [vmem:[%s979_s8] sm:$0x3] %vm167_vm1, %v574_v61 }
0x125d   :  { %647 = vst.msk [vmem:[%s979_s8 + $0xe] sm:$0x3] %vm167_vm1, %v608_v62 }

</bundles_post_ra>
